<compile_context>
chip_gen: v5e
topology: v5e:2x2
jax: 0.10.0
libtpu: 0.0.40
codegen_flags: <defaults>
</compile_context>

<pallas_src>
import jax
import jax.numpy as jnp
from jax.experimental import pallas as pl
from jax.experimental.pallas import tpu as pltpu


# ---------------------------------------------------------------------------
# Kernel 1: 3x3 stride-2 pad-1 convolution (use_conv=True path)
# ---------------------------------------------------------------------------
def _conv_downsample_kernel(p00_ref, p01_ref, p10_ref, p11_ref, w_ref, b_ref,
                            o_ref, col_ref):
    # p{p}{q}_ref : (1, Ho+1, Wo+1, C)  phase (p, q) of the zero-padded NHWC input,
    #               i.e. x_pad[n, p::2, q::2, :]
    # w_ref       : (9*C, TCO)          HWIO weights flattened over (kh, kw, cin)
    # b_ref       : (1, TCO)            bias tile
    # o_ref       : (1, Ho, Wo, TCO)    output tile
    # col_ref     : VMEM scratch (Ho, Wo, 9*C)  im2col slab
    Ho, Wo, tco = o_ref.shape[1], o_ref.shape[2], o_ref.shape[3]
    C = p00_ref.shape[3]
    phases = (p00_ref, p01_ref, p10_ref, p11_ref)

    # im2col: tap (kh, kw) of the stride-2 conv is a *contiguous* (Ho, Wo) window
    # of phase (kh % 2, kw % 2) shifted by (kh // 2, kw // 2).  9 plain VMEM slab
    # copies into scratch — no per-tap reshape, no accumulator living across taps.
    for kh in range(3):
        for kw in range(3):
            ph = phases[2 * (kh % 2) + (kw % 2)]
            oh, ow = kh // 2, kw // 2
            t = 3 * kh + kw
            col_ref[:, :, t * C:(t + 1) * C] = ph[0, oh:oh + Ho, ow:ow + Wo, :]

    # One deep MXU matmul over K = 9*C, f32 accumulation.
    col = col_ref[...].reshape(Ho * Wo, 9 * C)
    acc = jnp.dot(col, w_ref[...], preferred_element_type=jnp.float32)
    acc = acc + b_ref[...].astype(jnp.float32)                 # (1, TCO) broadcast
    o_ref[...] = acc.reshape(1, Ho, Wo, tco).astype(o_ref.dtype)


def downsample_conv(x_nchw, weight_oihw, bias):
    """Conv2d(C, Cout, 3, stride=2, padding=1): (N, C, H, W) -> (N, Cout, H//2, W//2)."""
    N, C, H, W = x_nchw.shape
    Cout = weight_oihw.shape[0]
    assert H % 2 == 0 and W % 2 == 0
    Ho, Wo = H // 2, W // 2

    # Glue (fusable by XLA: transpose + pad + phase slices; no full-tensor stack).
    x = jnp.transpose(x_nchw, (0, 2, 3, 1))                         # NHWC
    xp = jnp.pad(x, ((0, 0), (1, 1), (1, 1), (0, 0)))               # (N, H+2, W+2, C)
    phases = [xp[:, p::2, q::2, :] for p in (0, 1) for q in (0, 1)]  # 4 x (N, Ho+1, Wo+1, C)

    w2 = jnp.transpose(weight_oihw, (2, 3, 1, 0)).reshape(9 * C, Cout)  # (kh,kw,cin) x cout
    b2 = bias.reshape(1, Cout)

    # Cout tiling: lane-dense (>=128) tiles when channels allow; small-channel
    # configs (like the test) fall back to a single masked-store tile (tiny data).
    if Cout % 256 == 0:
        tco = 256
    elif Cout % 128 == 0:
        tco = 128
    else:
        tco = Cout
    gco = Cout // tco

    phase_spec = pl.BlockSpec((1, Ho + 1, Wo + 1, C), lambda n, j: (n, 0, 0, 0))
    out_nhwc = pl.pallas_call(
        _conv_downsample_kernel,
        out_shape=jax.ShapeDtypeStruct((N, Ho, Wo, Cout), x_nchw.dtype),
        grid=(N, gco),
        in_specs=[phase_spec, phase_spec, phase_spec, phase_spec,
                  pl.BlockSpec((9 * C, tco), lambda n, j: (0, j)),
                  pl.BlockSpec((1, tco), lambda n, j: (0, j))],
        out_specs=pl.BlockSpec((1, Ho, Wo, tco), lambda n, j: (n, 0, 0, j)),
        scratch_shapes=[pltpu.VMEM((Ho, Wo, 9 * C), x_nchw.dtype)],
        compiler_params=pltpu.CompilerParams(
            dimension_semantics=("parallel", "parallel"),
            vmem_limit_bytes=32 * 1024 * 1024),
    )(*phases, w2, b2)

    return jnp.transpose(out_nhwc, (0, 3, 1, 2))                    # back to NCHW


# ---------------------------------------------------------------------------
# Kernel 2: 2x2 stride-2 average pool (use_conv=False path) — pure NCHW
# ---------------------------------------------------------------------------
def _avgpool_kernel(p00_ref, p01_ref, p10_ref, p11_ref, o_ref):
    # p{p}{q}_ref : (1, C, Ho*Wo)   phase x[n, :, p::2, q::2], lane-dense last dim
    # o_ref       : (1, C, Ho*Wo)
    s = (p00_ref[...].astype(jnp.float32) + p01_ref[...].astype(jnp.float32)
         + p10_ref[...].astype(jnp.float32) + p11_ref[...].astype(jnp.float32))
    o_ref[...] = (s * 0.25).astype(o_ref.dtype)


def downsample_avgpool(x_nchw):
    """AvgPool2d(kernel_size=2, stride=2): (N, C, H, W) -> (N, C, H//2, W//2)."""
    N, C, H, W = x_nchw.shape
    assert H % 2 == 0 and W % 2 == 0
    Ho, Wo = H // 2, W // 2
    L = Ho * Wo

    # Four stride-2 phase slices, flattened so the kernel's last (lane) dim is Ho*Wo.
    phases = [x_nchw[:, :, p::2, q::2].reshape(N, C, L) for p in (0, 1) for q in (0, 1)]

    spec = pl.BlockSpec((1, C, L), lambda n: (n, 0, 0))
    out = pl.pallas_call(
        _avgpool_kernel,
        out_shape=jax.ShapeDtypeStruct((N, C, L), x_nchw.dtype),
        grid=(N,),
        in_specs=[spec, spec, spec, spec],
        out_specs=spec,
        compiler_params=pltpu.CompilerParams(
            dimension_semantics=("parallel",),
            vmem_limit_bytes=32 * 1024 * 1024),
    )(*phases)
    return out.reshape(N, C, Ho, Wo)


# ---------------------------------------------------------------------------
# Downsample module equivalent
# ---------------------------------------------------------------------------
class Downsample:
    def __init__(self, channels, use_conv, out_channel=None, *, key=None):
        self.channels = channels
        self.out_channel = out_channel or channels
        self.use_conv = use_conv
        if use_conv:
            key = key if key is not None else jax.random.PRNGKey(0)
            kw, kb = jax.random.split(key)
            fan_in = channels * 3 * 3
            bound = 1.0 / (fan_in ** 0.5)
            # deterministic synthetic init (same shapes as nn.Conv2d(C, Cout, 3, 2, 1))
            self.weight = jax.random.uniform(
                kw, (self.out_channel, channels, 3, 3), jnp.float32, -bound, bound)
            self.bias = jax.random.uniform(
                kb, (self.out_channel,), jnp.float32, -bound, bound)
        else:
            assert self.channels == self.out_channel

    def __call__(self, x):
        assert x.shape[1] == self.channels
        if self.use_conv:
            return downsample_conv(x, self.weight, self.bias)
        return downsample_avgpool(x)


# ---------------------------------------------------------------------------
# main: build deterministic inputs, run both paths, sanity-check vs pure JAX
# ---------------------------------------------------------------------------
if __name__ == "__main__":
    key = jax.random.PRNGKey(0)
    kx, kparam = jax.random.split(key)

    N, C, H, W = 2, 4, 16, 16
    Cout = 8
    x = jax.random.normal(kx, (N, C, H, W), jnp.float32)

    # --- use_conv=True path ---
    ds_conv = Downsample(C, use_conv=True, out_channel=Cout, key=kparam)
    y_conv = ds_conv(x)
    y_conv = jax.block_until_ready(y_conv)

    ref_conv = jax.lax.conv_general_dilated(
        x, ds_conv.weight, window_strides=(2, 2), padding=((1, 1), (1, 1)),
        dimension_numbers=("NCHW", "OIHW", "NCHW"),
    ) + ds_conv.bias.reshape(1, Cout, 1, 1)
    assert y_conv.shape == (N, Cout, H // 2, W // 2)
    assert jnp.allclose(y_conv, ref_conv, atol=1e-5, rtol=1e-5)

    # --- use_conv=False path (AvgPool2d(2, 2)) ---
    ds_pool = Downsample(C, use_conv=False)
    y_pool = ds_pool(x)
    y_pool = jax.block_until_ready(y_pool)

    ref_pool = jnp.mean(x.reshape(N, C, H // 2, 2, W // 2, 2), axis=(3, 5))
    assert y_pool.shape == (N, C, H // 2, W // 2)
    assert jnp.allclose(y_pool, ref_pool, atol=1e-6, rtol=1e-6)

    print("KERNEL_OK")
</pallas_src>

<mosaic_0001>
module attributes {stable_mosaic.version = 11 : i64} {
  func.func @_conv_downsample_kernel(%arg0: i32, %arg1: i32, %arg2: memref<1x9x9x4xf32, #tpu.memory_space<vmem>>, %arg3: memref<1x9x9x4xf32, #tpu.memory_space<vmem>>, %arg4: memref<1x9x9x4xf32, #tpu.memory_space<vmem>>, %arg5: memref<1x9x9x4xf32, #tpu.memory_space<vmem>>, %arg6: memref<36x8xf32, #tpu.memory_space<vmem>>, %arg7: memref<1x8xf32, #tpu.memory_space<vmem>>, %arg8: memref<1x8x8x8xf32, #tpu.memory_space<vmem>>, %arg9: memref<8x8x36xf32, #tpu.memory_space<vmem>>) attributes {dimension_semantics = [#tpu.dimension_semantics<parallel>, #tpu.dimension_semantics<parallel>], iteration_bounds = array<i64: 2, 1>, scalar_prefetch = 0 : i64, scratch_operands = 1 : i64, tpu.core_type = #tpu.core_type<tc>, window_params = [{transform_indices = @transform_0, window_bounds = array<i64: 1, 9, 9, 4>}, {transform_indices = @transform_1, window_bounds = array<i64: 1, 9, 9, 4>}, {transform_indices = @transform_2, window_bounds = array<i64: 1, 9, 9, 4>}, {transform_indices = @transform_3, window_bounds = array<i64: 1, 9, 9, 4>}, {transform_indices = @transform_4, window_bounds = array<i64: 36, 8>}, {transform_indices = @transform_5, window_bounds = array<i64: 1, 8>}, {transform_indices = @transform_6, window_bounds = array<i64: 1, 8, 8, 8>}]} {
    %c0 = arith.constant 0 : index
    %c0_0 = arith.constant 0 : index
    %c0_1 = arith.constant 0 : index
    %c0_2 = arith.constant 0 : index
    %0 = vector.load %arg2[%c0, %c0_0, %c0_1, %c0_2] : memref<1x9x9x4xf32, #tpu.memory_space<vmem>>, vector<1x8x8x4xf32>
    %1 = vector.shape_cast %0 : vector<1x8x8x4xf32> to vector<8x8x4xf32>
    %c0_3 = arith.constant 0 : index
    %c0_4 = arith.constant 0 : index
    %c0_5 = arith.constant 0 : index
    %2 = vector.load %arg9[%c0_3, %c0_4, %c0_5] : memref<8x8x36xf32, #tpu.memory_space<vmem>>, vector<8x8x4xf32>
    tpu.vector_store %arg9[%c0_3, %c0_4, %c0_5], %1 {strides = array<i32>} : memref<8x8x36xf32, #tpu.memory_space<vmem>>, vector<8x8x4xf32>,
    %c0_6 = arith.constant 0 : index
    %c0_7 = arith.constant 0 : index
    %c0_8 = arith.constant 0 : index
    %c0_9 = arith.constant 0 : index
    %3 = vector.load %arg3[%c0_6, %c0_7, %c0_8, %c0_9] : memref<1x9x9x4xf32, #tpu.memory_space<vmem>>, vector<1x8x8x4xf32>
    %4 = vector.shape_cast %3 : vector<1x8x8x4xf32> to vector<8x8x4xf32>
    %c0_10 = arith.constant 0 : index
    %c0_11 = arith.constant 0 : index
    %c4 = arith.constant 4 : index
    %5 = vector.load %arg9[%c0_10, %c0_11, %c4] : memref<8x8x36xf32, #tpu.memory_space<vmem>>, vector<8x8x4xf32>
    tpu.vector_store %arg9[%c0_10, %c0_11, %c4], %4 {strides = array<i32>} : memref<8x8x36xf32, #tpu.memory_space<vmem>>, vector<8x8x4xf32>,
    %c0_12 = arith.constant 0 : index
    %c0_13 = arith.constant 0 : index
    %c1 = arith.constant 1 : index
    %c0_14 = arith.constant 0 : index
    %6 = vector.load %arg2[%c0_12, %c0_13, %c1, %c0_14] : memref<1x9x9x4xf32, #tpu.memory_space<vmem>>, vector<1x8x8x4xf32>
    %7 = vector.shape_cast %6 : vector<1x8x8x4xf32> to vector<8x8x4xf32>
    %c0_15 = arith.constant 0 : index
    %c0_16 = arith.constant 0 : index
    %c8 = arith.constant 8 : index
    %8 = vector.load %arg9[%c0_15, %c0_16, %c8] : memref<8x8x36xf32, #tpu.memory_space<vmem>>, vector<8x8x4xf32>
    tpu.vector_store %arg9[%c0_15, %c0_16, %c8], %7 {strides = array<i32>} : memref<8x8x36xf32, #tpu.memory_space<vmem>>, vector<8x8x4xf32>,
    %c0_17 = arith.constant 0 : index
    %c0_18 = arith.constant 0 : index
    %c0_19 = arith.constant 0 : index
    %c0_20 = arith.constant 0 : index
    %9 = vector.load %arg4[%c0_17, %c0_18, %c0_19, %c0_20] : memref<1x9x9x4xf32, #tpu.memory_space<vmem>>, vector<1x8x8x4xf32>
    %10 = vector.shape_cast %9 : vector<1x8x8x4xf32> to vector<8x8x4xf32>
    %c0_21 = arith.constant 0 : index
    %c0_22 = arith.constant 0 : index
    %c12 = arith.constant 12 : index
    %11 = vector.load %arg9[%c0_21, %c0_22, %c12] : memref<8x8x36xf32, #tpu.memory_space<vmem>>, vector<8x8x4xf32>
    tpu.vector_store %arg9[%c0_21, %c0_22, %c12], %10 {strides = array<i32>} : memref<8x8x36xf32, #tpu.memory_space<vmem>>, vector<8x8x4xf32>,
    %c0_23 = arith.constant 0 : index
    %c0_24 = arith.constant 0 : index
    %c0_25 = arith.constant 0 : index
    %c0_26 = arith.constant 0 : index
    %12 = vector.load %arg5[%c0_23, %c0_24, %c0_25, %c0_26] : memref<1x9x9x4xf32, #tpu.memory_space<vmem>>, vector<1x8x8x4xf32>
    %13 = vector.shape_cast %12 : vector<1x8x8x4xf32> to vector<8x8x4xf32>
    %c0_27 = arith.constant 0 : index
    %c0_28 = arith.constant 0 : index
    %c16 = arith.constant 16 : index
    %14 = vector.load %arg9[%c0_27, %c0_28, %c16] : memref<8x8x36xf32, #tpu.memory_space<vmem>>, vector<8x8x4xf32>
    tpu.vector_store %arg9[%c0_27, %c0_28, %c16], %13 {strides = array<i32>} : memref<8x8x36xf32, #tpu.memory_space<vmem>>, vector<8x8x4xf32>,
    %c0_29 = arith.constant 0 : index
    %c0_30 = arith.constant 0 : index
    %c1_31 = arith.constant 1 : index
    %c0_32 = arith.constant 0 : index
    %15 = vector.load %arg4[%c0_29, %c0_30, %c1_31, %c0_32] : memref<1x9x9x4xf32, #tpu.memory_space<vmem>>, vector<1x8x8x4xf32>
    %16 = vector.shape_cast %15 : vector<1x8x8x4xf32> to vector<8x8x4xf32>
    %c0_33 = arith.constant 0 : index
    %c0_34 = arith.constant 0 : index
    %c20 = arith.constant 20 : index
    %17 = vector.load %arg9[%c0_33, %c0_34, %c20] : memref<8x8x36xf32, #tpu.memory_space<vmem>>, vector<8x8x4xf32>
    tpu.vector_store %arg9[%c0_33, %c0_34, %c20], %16 {strides = array<i32>} : memref<8x8x36xf32, #tpu.memory_space<vmem>>, vector<8x8x4xf32>,
    %c0_35 = arith.constant 0 : index
    %c1_36 = arith.constant 1 : index
    %c0_37 = arith.constant 0 : index
    %c0_38 = arith.constant 0 : index
    %18 = vector.load %arg2[%c0_35, %c1_36, %c0_37, %c0_38] : memref<1x9x9x4xf32, #tpu.memory_space<vmem>>, vector<1x8x8x4xf32>
    %19 = vector.shape_cast %18 : vector<1x8x8x4xf32> to vector<8x8x4xf32>
    %c0_39 = arith.constant 0 : index
    %c0_40 = arith.constant 0 : index
    %c24 = arith.constant 24 : index
    %20 = vector.load %arg9[%c0_39, %c0_40, %c24] : memref<8x8x36xf32, #tpu.memory_space<vmem>>, vector<8x8x4xf32>
    tpu.vector_store %arg9[%c0_39, %c0_40, %c24], %19 {strides = array<i32>} : memref<8x8x36xf32, #tpu.memory_space<vmem>>, vector<8x8x4xf32>,
    %c0_41 = arith.constant 0 : index
    %c1_42 = arith.constant 1 : index
    %c0_43 = arith.constant 0 : index
    %c0_44 = arith.constant 0 : index
    %21 = vector.load %arg3[%c0_41, %c1_42, %c0_43, %c0_44] : memref<1x9x9x4xf32, #tpu.memory_space<vmem>>, vector<1x8x8x4xf32>
    %22 = vector.shape_cast %21 : vector<1x8x8x4xf32> to vector<8x8x4xf32>
    %c0_45 = arith.constant 0 : index
    %c0_46 = arith.constant 0 : index
    %c28 = arith.constant 28 : index
    %23 = vector.load %arg9[%c0_45, %c0_46, %c28] : memref<8x8x36xf32, #tpu.memory_space<vmem>>, vector<8x8x4xf32>
    tpu.vector_store %arg9[%c0_45, %c0_46, %c28], %22 {strides = array<i32>} : memref<8x8x36xf32, #tpu.memory_space<vmem>>, vector<8x8x4xf32>,
    %c0_47 = arith.constant 0 : index
    %c1_48 = arith.constant 1 : index
    %c1_49 = arith.constant 1 : index
    %c0_50 = arith.constant 0 : index
    %24 = vector.load %arg2[%c0_47, %c1_48, %c1_49, %c0_50] : memref<1x9x9x4xf32, #tpu.memory_space<vmem>>, vector<1x8x8x4xf32>
    %25 = vector.shape_cast %24 : vector<1x8x8x4xf32> to vector<8x8x4xf32>
    %c0_51 = arith.constant 0 : index
    %c0_52 = arith.constant 0 : index
    %c32 = arith.constant 32 : index
    %26 = vector.load %arg9[%c0_51, %c0_52, %c32] : memref<8x8x36xf32, #tpu.memory_space<vmem>>, vector<8x8x4xf32>
    tpu.vector_store %arg9[%c0_51, %c0_52, %c32], %25 {strides = array<i32>} : memref<8x8x36xf32, #tpu.memory_space<vmem>>, vector<8x8x4xf32>,
    %c0_53 = arith.constant 0 : index
    %c0_54 = arith.constant 0 : index
    %c0_55 = arith.constant 0 : index
    %27 = vector.load %arg9[%c0_53, %c0_54, %c0_55] : memref<8x8x36xf32, #tpu.memory_space<vmem>>, vector<8x8x36xf32>
    %28 = vector.shape_cast %27 : vector<8x8x36xf32> to vector<64x36xf32>
    %c0_56 = arith.constant 0 : index
    %c0_57 = arith.constant 0 : index
    %29 = vector.load %arg6[%c0_56, %c0_57] : memref<36x8xf32, #tpu.memory_space<vmem>>, vector<36x8xf32>
    %cst = arith.constant dense<0.000000e+00> : vector<64x8xf32>
    %30 = tpu.matmul %28, %29, %cst {dimension_numbers = #tpu.dot_dimension_numbers<[1], [0], [0], [1], [0, 0, 1, 1], [], []>} : vector<64x36xf32>, vector<36x8xf32>, vector<64x8xf32> -> vector<64x8xf32>
    %c0_58 = arith.constant 0 : index
    %c0_59 = arith.constant 0 : index
    %31 = vector.load %arg7[%c0_58, %c0_59] : memref<1x8xf32, #tpu.memory_space<vmem>>, vector<1x8xf32>
    %32 = vector.broadcast %31 : vector<1x8xf32> to vector<64x8xf32>
    %33 = arith.addf %30, %32 : vector<64x8xf32>
    %34 = vector.shape_cast %33 : vector<64x8xf32> to vector<1x8x8x8xf32>
    %c0_60 = arith.constant 0 : index
    %c0_61 = arith.constant 0 : index
    %c0_62 = arith.constant 0 : index
    %c0_63 = arith.constant 0 : index
    %35 = vector.load %arg8[%c0_60, %c0_61, %c0_62, %c0_63] : memref<1x8x8x8xf32, #tpu.memory_space<vmem>>, vector<1x8x8x8xf32>
    tpu.vector_store %arg8[%c0_60, %c0_61, %c0_62, %c0_63], %34 {strides = array<i32>} : memref<1x8x8x8xf32, #tpu.memory_space<vmem>>, vector<1x8x8x8xf32>,
    return
  }
  func.func @transform_0(%arg0: i32, %arg1: i32) -> (i32, i32, i32, i32) {
    %c0_i32 = arith.constant 0 : i32
    %c0_i32_0 = arith.constant 0 : i32
    %c0_i32_1 = arith.constant 0 : i32
    %c0_i32_2 = arith.constant 0 : i32
    return %arg0, %c0_i32, %c0_i32_0, %c0_i32_1 : i32, i32, i32, i32
  }
  func.func @transform_1(%arg0: i32, %arg1: i32) -> (i32, i32, i32, i32) {
    %c0_i32 = arith.constant 0 : i32
    %c0_i32_0 = arith.constant 0 : i32
    %c0_i32_1 = arith.constant 0 : i32
    %c0_i32_2 = arith.constant 0 : i32
    return %arg0, %c0_i32, %c0_i32_0, %c0_i32_1 : i32, i32, i32, i32
  }
  func.func @transform_2(%arg0: i32, %arg1: i32) -> (i32, i32, i32, i32) {
    %c0_i32 = arith.constant 0 : i32
    %c0_i32_0 = arith.constant 0 : i32
    %c0_i32_1 = arith.constant 0 : i32
    %c0_i32_2 = arith.constant 0 : i32
    return %arg0, %c0_i32, %c0_i32_0, %c0_i32_1 : i32, i32, i32, i32
  }
  func.func @transform_3(%arg0: i32, %arg1: i32) -> (i32, i32, i32, i32) {
    %c0_i32 = arith.constant 0 : i32
    %c0_i32_0 = arith.constant 0 : i32
    %c0_i32_1 = arith.constant 0 : i32
    %c0_i32_2 = arith.constant 0 : i32
    return %arg0, %c0_i32, %c0_i32_0, %c0_i32_1 : i32, i32, i32, i32
  }
  func.func @transform_4(%arg0: i32, %arg1: i32) -> (i32, i32) {
    %c0_i32 = arith.constant 0 : i32
    %c0_i32_0 = arith.constant 0 : i32
    return %c0_i32, %arg1 : i32, i32
  }
  func.func @transform_5(%arg0: i32, %arg1: i32) -> (i32, i32) {
    %c0_i32 = arith.constant 0 : i32
    %c0_i32_0 = arith.constant 0 : i32
    return %c0_i32, %arg1 : i32, i32
  }
  func.func @transform_6(%arg0: i32, %arg1: i32) -> (i32, i32, i32, i32) {
    %c0_i32 = arith.constant 0 : i32
    %c0_i32_0 = arith.constant 0 : i32
    %c0_i32_1 = arith.constant 0 : i32
    return %arg0, %c0_i32, %c0_i32_0, %arg1 : i32, i32, i32, i32
  }
}

</mosaic_0001>

<bundles_post_ra>
// kernel: tpu_custom_call.1
= control target key start
LH: loop header
LB: loop body
LE: loop exit
PB: predicated region body
PF: predicated region fallthrough
CT: control target
= control target key end

     0   :  { %11 = vsyncpa [#allocation4], 0  ;;  %s1642_s0 = inlined_call_operand.vmem [shape: f32[2,9,9,4], index: 0, kind: input, shape index: {}]   ;;  %s1643_s1 = inlined_call_operand.vmem [shape: f32[2,9,9,4], index: 1, kind: input, shape index: {}]   ;;  %s1644_s2 = inlined_call_operand.vmem [shape: f32[2,9,9,4], index: 2, kind: input, shape index: {}]   ;;  %s1645_s3 = inlined_call_operand.vmem [shape: f32[2,9,9,4], index: 3, kind: input, shape index: {}]   ;;  %s1646_s4 = inlined_call_operand.vmem [shape: f32[36,8], index: 4, kind: input, shape index: {}]   ;;  %s1647_s5 = inlined_call_operand.vmem [shape: f32[1,8], index: 5, kind: input, shape index: {}]   ;;  %s1648_s6 = inlined_call_operand.hbm [shape: f32[2,8,8,8], index: 6, kind: output, shape index: {}]  }
   0x1   :  { %13 = vsyncpa [#allocation4 + $0x1], 0  ;;  %s1270_s21 = smov 0   ;;  %s1272_s22 = smov 0  }
   0x2   :  { %s1274_s23 = smov 0   ;;  %s1276_s24 = smov 0  }
   0x3   :  { %s1278_s25 = smov 0   ;;  %s1280_s26 = smov 0  }
   0x4 LB: > { %s1014_s27 = sadd.s32 4294967295, %s1224_s26   ;;  %s1015_s28 = sadd.s32 4294967294, %s1224_s26   ;;  %s1224_s26 = sphi %s1280_s26, %s19_s26   ;;  %s1220_s25 = sphi %s1278_s25, %s1657_s25   ;;  %s1216_s24 = sphi %s1276_s24, %s1656_s24   ;;  %s1212_s23 = sphi %s1274_s23, %s1655_s23   ;;  %s1208_s22 = sphi %s1272_s22, %s1654_s22   ;;  %s1204_s21 = sphi %s1270_s21, %s1653_s21  }
   0x5   : > { %s31_s29 = sadd.s32 1, %s1220_s25  ;;  %s196_s30 = sadd.s32 1, %s1212_s23 }
   0x6   : > { %p33_p0 = scmp.ge.s32.totalorder %s31_s29, 2  ;;  %p206_p1 = scmp.ne.s32.totalorder %s1212_s23, %s1208_s22 }
   0x7   : > { %p207_p2 = scmp.eq.s32.totalorder %s1014_s27, 1  ;;  %p212_p3 = scmp.ne.s32.totalorder %s1208_s22, %s1204_s21 }
   0x8   : > { %s1659_s29 = smov (%p33_p0, %s31_s29), 0  ;;  %p213_p5 = scmp.eq.s32.totalorder %s1015_s28, 1 }
   0x9   : > { %p1310_p4 = por %p207_p2, %p206_p1  ;;  %s191_s8 = ssub.s32 %s1220_s25, %s1659_s29 }
   0xa   : > { %p1020_p6 = scmp.ge.s32.totalorder %s1224_s26, 1  ;;  %p194_p7 = scmp.eq.s32.totalorder %s191_s8, 0 }
   0xb   : > { %p1317_p8 = por %p213_p5, %p212_p3  ;;  %p276_p9 = scmp.lt.s32.totalorder %s1224_s26, 3 }
   0xc   : > { %s1323_s10 = scalar_select %p194_p7, %s1212_s23, %s196_s30  }
   0xd   : > { %p277_p10 = pnand %p1020_p6, %p276_p9 }
   0xe   : > { %p328_p11 = scmp.lt.s32.totalorder (!%p277_p10), %s1216_s24, 1  ;;  %s1226_s19 = smov (!%p277_p10), 4  }
   0xf   : > { %280 = sbr.rel (%p277_p10) target bundleno = 449 (0x1c1), region = 44  ;;  %s1649_s20 = smov (!%p277_p10), 8  }
  0x10   : > { %s1228_s8 = smov (!%p277_p10), 12   ;;  %s1229_s16 = smov (!%p277_p10), 16  }
  0x11   : > { %s1230_s17 = smov (!%p277_p10), 20   ;;  %s1232_s27 = smov (!%p277_p10), 28  }
  0x12   : > { %s1233_s28 = smov (!%p277_p10), 32  }
  0x14   : > { %s329_s11 = scalar_select %p328_p11, %s1216_s24, 1  ;;  %vm363_vm0 = vcmask 31744   ;;  %vm412_vm1 = vcmask 64544   ;;  %vm461_vm2 = vcmask 97344   ;;  %vm510_vm3 = vcmask 130144   ;;  %v777_v56 = vld [vmem:[%s1646_s4 + $0x18] sm:$0xff] }
  0x15   : > { %vm559_vm4 = vcmask 162944   ;;  %v778_v53 = vld [vmem:[%s1646_s4 + $0x20] sm:$0xf]  ;;  %vm808_vm5 = vcmask 1043456   ;;  %vm608_vm6 = vcmask 195744   ;;  %v776_v57 = vld [vmem:[%s1646_s4 + $0x10] sm:$0xff] }
  0x16   : > { %s1080_s12 = smul.u32 144, %s329_s11  ;;  %1066 = vmatpush.msk.msra.mxu2 %vm808_vm5, %v778_v53  ;;  %1067 = vmatpush.msk.msra.mxu3 %vm808_vm5, %v778_v53  ;;  %v775_v61 = vld [vmem:[%s1646_s4 + $0x8] sm:$0xff]  ;;  %v774_v63 = vld [vmem:[%s1646_s4] sm:$0xff]  ;;  %vm658_vm7 = vcmask 228544   ;;  %vm708_vm8 = vcmask 261344   ;;  %vm757_vm9 = vcmask 294144  }
  0x17   : > { %1050 = vmatpush.msk.msra.mxu0 %vm808_vm5, %v778_v53  ;;  %1065 = vmatpush.msk.msra.mxu1 %vm808_vm5, %v778_v53  ;;  %vm783_vm10 = vcmask 293888   ;;  %vm853_vm11 = vcmask 64512  }
  0x18   : > { %s1330_s15 = scalar_lea.vmem %s1643_s1, %s1080_s12  ;;  %s1335_s18 = scalar_lea.vmem %s1642_s0, %s1080_s12  ;;  %1069 = vmatpush.msra.mxu2 %v777_v56  ;;  %1070 = vmatpush.msra.mxu3 %v777_v56 }
  0x19   : > { %v1338_v0 = vld [vmem:[%s1330_s15 + $0x40] sm:$0xff]  ;;  %s1350_s30 = scalar_lea.vmem %s1644_s2, %s1080_s12  ;;  %s1368_s14 = scalar_lea.vmem %s1645_s3, %s1080_s12  ;;  %v1030_v10 = vld [vmem:[%s1335_s18 + $0x50] sm:$0xff]  ;;  %824 = vmatpush.msra.mxu0 %v777_v56  ;;  %1068 = vmatpush.msra.mxu1 %v777_v56 }
  0x1a   : > { %v1341_v1 = vld [vmem:[%s1335_s18 + $0x41] sm:$0xff]  ;;  %396 = vrot.lane.b32.xlu0 %v1338_v0, %s1226_s19  ;;  %s1231_s12 = smov 24   ;;  %v1032_v11 = vld [vmem:[%s1335_s18 + $0x70] sm:$0xff]  ;;  %369 = vst.msk [vmem:[#allocation2 + $0x28] sm:$0xff] %vm363_vm0, %v1030_v10  ;;  %1072 = vmatpush.msra.mxu2 %v776_v57 }
  0x1b   : > { %445 = vrot.lane.b32.xlu1 %v1341_v1, %s1649_s20  ;;  %v474_v2 = vld [vmem:[%s1350_s30 + $0x40] sm:$0xff]  ;;  %v1038_v14 = vld [vmem:[%s1330_s15 + $0x50] sm:$0xff]  ;;  %371 = vst.msk [vmem:[#allocation2 + $0x38] sm:$0xff] %vm363_vm0, %v1032_v11  ;;  %1073 = vmatpush.msra.mxu3 %v776_v57 }
  0x1c   : > { %494 = vrot.lane.b32.xlu2 %v474_v2, %s1228_s8  ;;  %v1355_v3 = vld [vmem:[%s1330_s15 + $0x60] sm:$0xff]  ;;  %v1040_v15 = vld [vmem:[%s1330_s15 + $0x70] sm:$0xff]  ;;  %825 = vmatpush.msra.mxu0 %v776_v57 }
  0x1d   : > { %v1358_v4 = vld [vmem:[%s1335_s18 + $0x61] sm:$0xff]  ;;  %v1046_v18 = vld [vmem:[%s1335_s18 + $0x51] sm:$0xff]  ;;  %1071 = vmatpush.msra.mxu1 %v776_v57  ;;  %1075 = vmatpush.msra.mxu2 %v775_v61 }
  0x1e   : > { %v476_v5 = vld [vmem:[%s1350_s30 + $0x60] sm:$0xff]  ;;  %v1048_v19 = vld [vmem:[%s1335_s18 + $0x71] sm:$0xff]  ;;  %1076 = vmatpush.msra.mxu3 %v775_v61  ;;  %826 = vmatpush.msra.mxu0 %v775_v61 }
  0x1f   : > { %v523_v6 = vld [vmem:[%s1368_s14 + $0x40] sm:$0xff]  ;;  %v475_v24 = vld [vmem:[%s1350_s30 + $0x50] sm:$0xff]  ;;  %1074 = vmatpush.msra.mxu1 %v775_v61  ;;  %1078 = vmatpush.msra.mxu2 %v774_v63 }
  0x20   : > { %v525_v7 = vld [vmem:[%s1368_s14 + $0x60] sm:$0xff]  ;;  %v477_v25 = vld [vmem:[%s1350_s30 + $0x70] sm:$0xff]  ;;  %1079 = vmatpush.msra.mxu3 %v774_v63  ;;  %827 = vmatpush.msra.mxu0 %v774_v63 }
  0x21   : > { %v572_v8 = vld [vmem:[%s1350_s30 + $0x41] sm:$0xff]  ;;  %v524_v29 = vld [vmem:[%s1368_s14 + $0x50] sm:$0xff]  ;;  %1077 = vmatpush.msra.mxu1 %v774_v63 }
  0x22   : > { %400 = vrot.lane.b32.xlu0 %v1355_v3, %s1226_s19  ;;  %v574_v9 = vld [vmem:[%s1350_s30 + $0x61] sm:$0xff]  ;;  %v1026_v31 = vld [vmem:[%s1335_s18 + $0x10] sm:$0xff] }
  0x23   : > { %449 = vrot.lane.b32.xlu1 %v1358_v4, %s1649_s20  ;;  %v372_v12 = vld [vmem:[%s1330_s15] sm:$0xff]  ;;  %v526_v32 = vld [vmem:[%s1368_s14 + $0x70] sm:$0xff]  ;;  %365 = vst.msk [vmem:[#allocation2 + $0x8] sm:$0xff] %vm363_vm0, %v1026_v31 }
  0x24   : > { %498 = vrot.lane.b32.xlu2 %v476_v5, %s1228_s8  ;;  %v1385_v13 = vld [vmem:[%s1330_s15 + $0x20] sm:$0xff]  ;;  %v1028_v33 = vld [vmem:[%s1335_s18 + $0x30] sm:$0xff] }
  0x25   : > { %v421_v16 = vld [vmem:[%s1335_s18 + $0x1] sm:$0xff]  ;;  %367 = vst.msk [vmem:[#allocation2 + $0x18] sm:$0xff] %vm363_vm0, %v1028_v33  ;;  %v573_v34 = vld [vmem:[%s1350_s30 + $0x51] sm:$0xff] }
  0x26   : > { %v1397_v17 = vld [vmem:[%s1335_s18 + $0x21] sm:$0xff]  ;;  %v575_v35 = vld [vmem:[%s1350_s30 + $0x71] sm:$0xff] }
  0x27   : > { %v470_v20 = vld [vmem:[%s1350_s30] sm:$0xff]  ;;  %v1034_v37 = vld [vmem:[%s1330_s15 + $0x10] sm:$0xff] }
  0x28   : > { %v472_v21 = vld [vmem:[%s1350_s30 + $0x20] sm:$0xff]  ;;  %v1036_v38 = vld [vmem:[%s1330_s15 + $0x30] sm:$0xff] }
  0x29   : > { %v519_v22 = vld [vmem:[%s1368_s14] sm:$0xff]  ;;  %v1042_v41 = vld [vmem:[%s1335_s18 + $0x11] sm:$0xff] }
  0x2a   : > { %543 = vrot.lane.b32.xlu0 %v523_v6, %s1229_s16  ;;  %v521_v23 = vld [vmem:[%s1368_s14 + $0x20] sm:$0xff]  ;;  %v1044_v42 = vld [vmem:[%s1335_s18 + $0x31] sm:$0xff] }
  0x2b   : > { %547 = vrot.lane.b32.xlu1 %v525_v7, %s1229_s16  ;;  %v568_v26 = vld [vmem:[%s1350_s30 + $0x1] sm:$0xff]  ;;  %v471_v59 = vld [vmem:[%s1350_s30 + $0x10] sm:$0xff] }
  0x2c   : > { %592 = vrot.lane.b32.xlu2 %v572_v8, %s1230_s17  ;;  %v570_v27 = vld [vmem:[%s1350_s30 + $0x21] sm:$0xff]  ;;  %v473_v62 = vld [vmem:[%s1350_s30 + $0x30] sm:$0xff] }
  0x2d   : > { %v1031_v28 = vld [vmem:[%s1335_s18 + $0x60] sm:$0xff]  ;;  %v522_v5 = vld [vmem:[%s1368_s14 + $0x30] sm:$0xff] }
  0x2e   : > { %v1428_v30 = vld [vmem:[%s1335_s18 + $0x40] sm:$0xff]  ;;  %370 = vst.msk [vmem:[#allocation2 + $0x30] sm:$0xff] %vm363_vm0, %v1031_v28  ;;  %v569_v7 = vld [vmem:[%s1350_s30 + $0x11] sm:$0xff] }
  0x2f   : > { %368 = vst.msk [vmem:[#allocation2 + $0x20] sm:$0xff] %vm363_vm0, %v1428_v30  ;;  %v1033_v40 = vld [vmem:[%s1335_s18 + $0x80] sm:$0xff] }
  0x30   : > { %v355_v44 = vld [vmem:[%s1335_s18] sm:$0xff] }
  0x31   : > { %364 = vst.msk [vmem:[#allocation2] sm:$0xff] %vm363_vm0, %v355_v44  ;;  %v1041_v48 = vld [vmem:[%s1330_s15 + $0x80] sm:$0xff] }
  0x32   : > { %596 = vrot.lane.b32.xlu0 %v574_v9, %s1230_s17  ;;  %v1470_v49 = vld [vmem:[%s1335_s18 + $0x20] sm:$0xff] }
  0x33   : > { %642 = vrot.lane.b32.xlu1 %v1030_v10, %s1231_s12  ;;  %366 = vst.msk [vmem:[#allocation2 + $0x10] sm:$0xff] %vm363_vm0, %v1470_v49  ;;  %v1049_v58 = vld [vmem:[%s1335_s18 + $0x81] sm:$0xff]  ;;  %v571_v10 = vld [vmem:[%s1350_s30 + $0x31] sm:$0xff] }
  0x34   : > { %646 = vrot.lane.b32.xlu2 %v1032_v11, %s1231_s12 }
  0x3a   : > { %388 = vrot.lane.b32.xlu0 %v372_v12, %s1226_s19 }
  0x3b   : > { %392 = vrot.lane.b32.xlu1 %v1385_v13, %s1226_s19 }
  0x3c   : > { %692 = vrot.lane.b32.xlu2 %v1038_v14, %s1232_s27 }
  0x42   : > { %696 = vrot.lane.b32.xlu0 %v1040_v15, %s1232_s27 }
  0x43   : > { %437 = vrot.lane.b32.xlu1 %v421_v16, %s1649_s20 }
  0x44   : > { %441 = vrot.lane.b32.xlu2 %v1397_v17, %s1649_s20 }
  0x4a   : > { %741 = vrot.lane.b32.xlu0 %v1046_v18, %s1233_s28 }
  0x4b   : > { %745 = vrot.lane.b32.xlu1 %v1048_v19, %s1233_s28 }
  0x4c   : > { %398 = vrot.lane.b32.xlu2 %v1038_v14, %s1226_s19 }
  0x52   : > { %402 = vrot.lane.b32.xlu0 %v1040_v15, %s1226_s19 }
  0x53   : > { %486 = vrot.lane.b32.xlu1 %v470_v20, %s1228_s8 }
  0x54   : > { %490 = vrot.lane.b32.xlu2 %v472_v21, %s1228_s8 }
  0x5a   : > { %447 = vrot.lane.b32.xlu0 %v1046_v18, %s1649_s20 }
  0x5b   : > { %451 = vrot.lane.b32.xlu1 %v1048_v19, %s1649_s20 }
  0x5c   : > { %535 = vrot.lane.b32.xlu2 %v519_v22, %s1229_s16 }
  0x62   : > { %539 = vrot.lane.b32.xlu0 %v521_v23, %s1229_s16 }
  0x63   : > { %496 = vrot.lane.b32.xlu1 %v475_v24, %s1228_s8 }
  0x64   : > { %500 = vrot.lane.b32.xlu2 %v477_v25, %s1228_s8 }
  0x6a   : > { %584 = vrot.lane.b32.xlu0 %v568_v26, %s1230_s17 }
  0x6b   : > { %588 = vrot.lane.b32.xlu1 %v570_v27, %s1230_s17 }
  0x6c   : > { %545 = vrot.lane.b32.xlu2 %v524_v29, %s1229_s16 }
  0x72   : > { %549 = vrot.lane.b32.xlu0 %v526_v32, %s1229_s16 }
  0x73   : > { %634 = vrot.lane.b32.xlu1 %v1026_v31, %s1231_s12 }
  0x74   : > { %638 = vrot.lane.b32.xlu2 %v1028_v33, %s1231_s12 }
  0x76   : > { %v495_v36 = vpop.permute.xlu2 %494 }
  0x7a   : > { %594 = vrot.lane.b32.xlu0 %v573_v34, %s1230_s17 }
  0x7b   : > { %598 = vrot.lane.b32.xlu1 %v575_v35, %s1230_s17 }
  0x7c   : > { %684 = vrot.lane.b32.xlu2 %v1034_v37, %s1232_s27 }
  0x7e   : > { %v499_v39 = vpop.permute.xlu2 %498 }
  0x82   : > { %688 = vrot.lane.b32.xlu0 %v1036_v38, %s1232_s27 }
  0x83   : > { %644 = vrot.lane.b32.xlu1 %v1031_v28, %s1231_s12 }
  0x84   : > { %648 = vrot.lane.b32.xlu2 %v1033_v40, %s1231_s12 }
  0x86   : > { %v593_v43 = vpop.permute.xlu2 %592 }
  0x8a   : > { %733 = vrot.lane.b32.xlu0 %v1042_v41, %s1233_s28 }
  0x8b   : > { %737 = vrot.lane.b32.xlu1 %v1044_v42, %s1233_s28 }
  0x8c   : > { %v397_v45 = vpop.permute.xlu0 %396  ;;  %390 = vrot.lane.b32.xlu2 %v1034_v37, %s1226_s19 }
  0x8d   : > { %v446_v46 = vpop.permute.xlu1 %445  ;;  %417 = vst.msk [vmem:[#allocation2 + $0x20] sm:$0xff] %vm412_vm1, %v397_v45 }
  0x8e   : > { %466 = vst.msk [vmem:[#allocation2 + $0x20] sm:$0xff] %vm461_vm2, %v446_v46  ;;  %v647_v47 = vpop.permute.xlu2 %646 }
  0x8f   : > { %515 = vst.msk [vmem:[#allocation2 + $0x20] sm:$0xff] %vm510_vm3, %v495_v36 }
  0x92   : > { %394 = vrot.lane.b32.xlu0 %v1036_v38, %s1226_s19 }
  0x93   : > { %694 = vrot.lane.b32.xlu1 %v1355_v3, %s1232_s27 }
  0x94   : > { %v401_v50 = vpop.permute.xlu0 %400  ;;  %698 = vrot.lane.b32.xlu2 %v1041_v48, %s1232_s27 }
  0x95   : > { %v450_v51 = vpop.permute.xlu1 %449  ;;  %419 = vst.msk [vmem:[#allocation2 + $0x30] sm:$0xff] %vm412_vm1, %v401_v50 }
  0x96   : > { %468 = vst.msk [vmem:[#allocation2 + $0x30] sm:$0xff] %vm461_vm2, %v450_v51  ;;  %v693_v52 = vpop.permute.xlu2 %692 }
  0x97   : > { %517 = vst.msk [vmem:[#allocation2 + $0x30] sm:$0xff] %vm510_vm3, %v499_v39 }
  0x9a   : > { %439 = vrot.lane.b32.xlu0 %v1042_v41, %s1649_s20 }
  0x9b   : > { %443 = vrot.lane.b32.xlu1 %v1044_v42, %s1649_s20  ;;  %s325_s20 = sand.u32 1, %s1208_s22  }
  0x9c   : > { %v544_v54 = vpop.permute.xlu0 %543  ;;  %743 = vrot.lane.b32.xlu2 %v1358_v4, %s1233_s28  ;;  %v520_v4 = vld [vmem:[%s1368_s14 + $0x10] sm:$0xff]  ;;  %s1021_s30 = sshll.u32 %s325_s20, 6  ;;  %s863_s11 = scalar_lea.sflag [#allocation4], %s325_s20 }
  0x9d   : > { %v548_v55 = vpop.permute.xlu1 %547  ;;  %564 = vst.msk [vmem:[#allocation2 + $0x20] sm:$0xff] %vm559_vm4, %v544_v54 }
  0x9e   : > { %566 = vst.msk [vmem:[#allocation2 + $0x30] sm:$0xff] %vm559_vm4, %v548_v55  ;;  %v442_v60 = vpop.permute.xlu2 %441 }
  0x9f   : > { %613 = vst.msk [vmem:[#allocation2 + $0x20] sm:$0xff] %vm608_vm6, %v593_v43 }
  0xa2   : > { %747 = vrot.lane.b32.xlu0 %v1049_v58, %s1233_s28 }
  0xa3   : > { %488 = vrot.lane.b32.xlu1 %v471_v59, %s1228_s8 }
  0xa4   : > { %v597_v2 = vpop.permute.xlu0 %596  ;;  %492 = vrot.lane.b32.xlu2 %v473_v62, %s1228_s8  ;;  %s1166_s8 = scalar_lea.hbm %s1648_s6, 128 }
  0xa5   : > { %v643_v3 = vpop.permute.xlu1 %642  ;;  %615 = vst.msk [vmem:[#allocation2 + $0x30] sm:$0xff] %vm608_vm6, %v597_v2  ;;  %v1145_v2 = vld [vmem:[%s1647_s5] ss:$0 sm:$0xff] }
  0xa6   : > { %663 = vst.msk [vmem:[#allocation2 + $0x20] sm:$0xff] %vm658_vm7, %v643_v3  ;;  %v399_v6 = vpop.permute.xlu2 %398 }
  0xa7   : > { %665 = vst.msk [vmem:[#allocation2 + $0x30] sm:$0xff] %vm658_vm7, %v647_v47 }
  0xa8   : > { %713 = vst.msk [vmem:[#allocation2 + $0x20] sm:$0xff] %vm708_vm8, %v693_v52 }
  0xa9   : > { %418 = vst.msk [vmem:[#allocation2 + $0x28] sm:$0xff] %vm412_vm1, %v399_v6 }
  0xaa   : > { %537 = vrot.lane.b32.xlu0 %v520_v4, %s1229_s16 }
  0xab   : > { %541 = vrot.lane.b32.xlu1 %v522_v5, %s1229_s16  ;;  %s327_s16 = scalar_lea.vmem [#allocation3], %s1021_s30 }
  0xac   : > { %v389_v8 = vpop.permute.xlu0 %388  ;;  %586 = vrot.lane.b32.xlu2 %v569_v7, %s1230_s17  ;;  %s876_s15 = sshll.u32 %s327_s16, 4  ;;  %s877_s15 = int_to_ptr.vmem [resolvable:$true] %s876_s15 }
  0xad   : > { %v393_v9 = vpop.permute.xlu1 %392  ;;  %413 = vst.msk [vmem:[#allocation2] sm:$0xff] %vm412_vm1, %v389_v8 }
  0xae   : > { %415 = vst.msk [vmem:[#allocation2 + $0x10] sm:$0xff] %vm412_vm1, %v393_v9  ;;  %v491_v11 = vpop.permute.xlu2 %490 }
  0xaf   : > { %464 = vst.msk [vmem:[#allocation2 + $0x10] sm:$0xff] %vm461_vm2, %v442_v60 }
  0xb0   : > { %513 = vst.msk [vmem:[#allocation2 + $0x10] sm:$0xff] %vm510_vm3, %v491_v11 }
  0xb2   : > { %590 = vrot.lane.b32.xlu0 %v571_v10, %s1230_s17  ;;  %s1064_s17 = sshll.u32 %s1216_s24, 6 }
  0xb3   : > { %636 = vrot.lane.b32.xlu1 %v1470_v49, %s1231_s12 }
  0xb4   : > { %v697_v12 = vpop.permute.xlu0 %696  ;;  %640 = vrot.lane.b32.xlu2 %v1428_v30, %s1231_s12 }
  0xb5   : > { %v438_v14 = vpop.permute.xlu1 %437  ;;  %715 = vst.msk [vmem:[#allocation2 + $0x30] sm:$0xff] %vm708_vm8, %v697_v12 }
  0xb6   : > { %462 = vst.msk [vmem:[#allocation2] sm:$0xff] %vm461_vm2, %v438_v14  ;;  %v536_v15 = vpop.permute.xlu2 %535 }
  0xba   : > { %686 = vrot.lane.b32.xlu0 %v1385_v13, %s1232_s27 }
  0xbb   : > { %690 = vrot.lane.b32.xlu1 %v1338_v0, %s1232_s27 }
  0xbc   : > { %v742_v16 = vpop.permute.xlu0 %741  ;;  %735 = vrot.lane.b32.xlu2 %v1397_v17, %s1233_s28 }
  0xbd   : > { %v746_v18 = vpop.permute.xlu1 %745  ;;  %762 = vst.msk [vmem:[#allocation2 + $0x20] sm:$0xff] %vm757_vm9, %v742_v16 }
  0xbe   : > { %764 = vst.msk [vmem:[#allocation2 + $0x30] sm:$0xff] %vm757_vm9, %v746_v18  ;;  %v501_v19 = vpop.permute.xlu2 %500 }
  0xc2   : > { %739 = vrot.lane.b32.xlu0 %v1341_v1, %s1233_s28  ;;  %s875_s28 = scalar_lea.hbm %s1648_s6, %s1064_s17 }
  0xc3   : > { %s878_s19 = sshll.u32 %s875_s28, 4  ;;  %s879_s19 = int_to_ptr.hbm [resolvable:$true] %s878_s19 }
  0xc4   : > { %v403_v20 = vpop.permute.xlu0 %402  ;;  %v770_v13 = vld [vmem:[#allocation2 + $0x20] sm:$0xff]  ;;  %s1160_s24 = sshra.s32 %s879_s19, 4  ;;  %s1161_s24 = int_to_ptr.hbm [resolvable:$true] %s1160_s24 }
  0xc5   : > { %v487_v21 = vpop.permute.xlu1 %486  ;;  %420 = vst.msk [vmem:[#allocation2 + $0x38] sm:$0xff] %vm412_vm1, %v403_v20  ;;  %1055 = vmatmul.msk.f32.vlgmr.msra.gmra.mxu2 %vm783_vm10, %v770_v13  ;;  %v772_v0 = vld [vmem:[#allocation2 + $0x30] sm:$0xff]  ;;  %s1162_s18 = scalar_lea.hbm %s1161_s24, 64  ;;  %p1167_p1 = scmp.lt.s32.totalorder %s1161_s24, %s1648_s6 }
  0xc6   : > { %511 = vst.msk [vmem:[#allocation2] sm:$0xff] %vm510_vm3, %v487_v21  ;;  %1057 = vmatmul.msk.f32.vlgmr.msra.gmra.mxu3 %vm783_vm10, %v772_v0  ;;  %v546_v17 = vpop.permute.xlu2 %545  ;;  %p1163_p12 = scmp.ne.s32.totalorder %s1161_s24, %s1162_s18  ;;  %p1168_p2 = scmp.lt.s32.totalorder %s1166_s8, %s1162_s18 }
  0xc7   : > { %560 = vst.msk [vmem:[#allocation2] sm:$0xff] %vm559_vm4, %v536_v15 }
  0xc8   : > { %p1164_p13 = pnand %p1163_p12, %p1310_p4  ;;  %p1169_p3 = por %p1168_p2, %p1167_p1 }
  0xca   : > { %p1165_p0 = pneg %p1164_p13 }
  0xcc   : > { %v448_v22 = vpop.permute.xlu0 %447  ;;  %p1170_p5 = pnand %p1169_p3, %p1165_p0 }
  0xcd   : > { %v452_v23 = vpop.permute.xlu1 %451  ;;  %467 = vst.msk [vmem:[#allocation2 + $0x28] sm:$0xff] %vm461_vm2, %v448_v22 }
  0xce   : > { %469 = vst.msk [vmem:[#allocation2 + $0x38] sm:$0xff] %vm461_vm2, %v452_v23  ;;  %v639_v1 = vpop.permute.xlu2 %638 }
  0xcf   : > { %518 = vst.msk [vmem:[#allocation2 + $0x38] sm:$0xff] %vm510_vm3, %v501_v19 }
  0xd4   : > { %v540_v24 = vpop.permute.xlu0 %539 }
  0xd5   : > { %v497_v25 = vpop.permute.xlu1 %496  ;;  %562 = vst.msk [vmem:[#allocation2 + $0x10] sm:$0xff] %vm559_vm4, %v540_v24 }
  0xd6   : > { %516 = vst.msk [vmem:[#allocation2 + $0x28] sm:$0xff] %vm510_vm3, %v497_v25  ;;  %v685_v26 = vpop.permute.xlu2 %684 }
  0xd7   : > { %565 = vst.msk [vmem:[#allocation2 + $0x28] sm:$0xff] %vm559_vm4, %v546_v17 }
  0xdc   : > { %v585_v27 = vpop.permute.xlu0 %584 }
  0xdd   : > { %v589_v28 = vpop.permute.xlu1 %588  ;;  %609 = vst.msk [vmem:[#allocation2] sm:$0xff] %vm608_vm6, %v585_v27 }
  0xde   : > { %611 = vst.msk [vmem:[#allocation2 + $0x10] sm:$0xff] %vm608_vm6, %v589_v28  ;;  %v649_v29 = vpop.permute.xlu2 %648 }
  0xdf   : > { %661 = vst.msk [vmem:[#allocation2 + $0x10] sm:$0xff] %vm658_vm7, %v639_v1 }
  0xe4   : > { %v550_v30 = vpop.permute.xlu0 %549 }
  0xe5   : > { %v635_v31 = vpop.permute.xlu1 %634  ;;  %567 = vst.msk [vmem:[#allocation2 + $0x38] sm:$0xff] %vm559_vm4, %v550_v30 }
  0xe6   : > { %659 = vst.msk [vmem:[#allocation2] sm:$0xff] %vm658_vm7, %v635_v31  ;;  %v391_v32 = vpop.permute.xlu2 %390 }
  0xe7   : > { %709 = vst.msk [vmem:[#allocation2] sm:$0xff] %vm708_vm8, %v685_v26 }
  0xe8   : > { %414 = vst.msk [vmem:[#allocation2 + $0x8] sm:$0xff] %vm412_vm1, %v391_v32 }
  0xec   : > { %v595_v33 = vpop.permute.xlu0 %594 }
  0xed   : > { %v599_v34 = vpop.permute.xlu1 %598  ;;  %614 = vst.msk [vmem:[#allocation2 + $0x28] sm:$0xff] %vm608_vm6, %v595_v33 }
  0xee   : > { %616 = vst.msk [vmem:[#allocation2 + $0x38] sm:$0xff] %vm608_vm6, %v599_v34  ;;  %v699_v35 = vpop.permute.xlu2 %698 }
  0xef   : > { %666 = vst.msk [vmem:[#allocation2 + $0x38] sm:$0xff] %vm658_vm7, %v649_v29 }
  0xf0   : > { %716 = vst.msk [vmem:[#allocation2 + $0x38] sm:$0xff] %vm708_vm8, %v699_v35 }
  0xf4   : > { %v689_v36 = vpop.permute.xlu0 %688 }
  0xf5   : > { %v645_v37 = vpop.permute.xlu1 %644  ;;  %711 = vst.msk [vmem:[#allocation2 + $0x10] sm:$0xff] %vm708_vm8, %v689_v36 }
  0xf6   : > { %664 = vst.msk [vmem:[#allocation2 + $0x28] sm:$0xff] %vm658_vm7, %v645_v37  ;;  %v744_v40 = vpop.permute.xlu2 %743 }
  0xfc   : > { %v734_v38 = vpop.permute.xlu0 %733 }
  0xfd   : > { %v738_v39 = vpop.permute.xlu1 %737  ;;  %758 = vst.msk [vmem:[#allocation2] sm:$0xff] %vm757_vm9, %v734_v38 }
  0xfe   : > { %760 = vst.msk [vmem:[#allocation2 + $0x10] sm:$0xff] %vm757_vm9, %v738_v39  ;;  %v493_v45 = vpop.permute.xlu2 %492 }
 0x104   : > { %v395_v41 = vpop.permute.xlu0 %394  ;;  %v766_v42 = vld [vmem:[#allocation2] sm:$0xff] }
 0x105   : > { %v695_v43 = vpop.permute.xlu1 %694  ;;  %416 = vst.msk [vmem:[#allocation2 + $0x18] sm:$0xff] %vm412_vm1, %v395_v41  ;;  %1051 = vmatmul.msk.f32.vlgmr.msra.gmra.mxu0 %vm783_vm10, %v766_v42  ;;  %v768_v44 = vld [vmem:[#allocation2 + $0x10] sm:$0xff] }
 0x106   : > { %714 = vst.msk [vmem:[#allocation2 + $0x28] sm:$0xff] %vm708_vm8, %v695_v43  ;;  %1053 = vmatmul.msk.f32.vlgmr.msra.gmra.mxu1 %vm783_vm10, %v768_v44  ;;  %v587_v51 = vpop.permute.xlu2 %586 }
 0x107   : > { %763 = vst.msk [vmem:[#allocation2 + $0x28] sm:$0xff] %vm757_vm9, %v744_v40 }
 0x10c   : > { %v440_v46 = vpop.permute.xlu0 %439 }
 0x10d   : > { %v444_v47 = vpop.permute.xlu1 %443  ;;  %463 = vst.msk [vmem:[#allocation2 + $0x8] sm:$0xff] %vm461_vm2, %v440_v46 }
 0x10e   : > { %465 = vst.msk [vmem:[#allocation2 + $0x18] sm:$0xff] %vm461_vm2, %v444_v47  ;;  %v771_v48 = vld [vmem:[#allocation2 + $0x28] sm:$0xff]  ;;  %v641_v55 = vpop.permute.xlu2 %640 }
 0x10f   : > { %514 = vst.msk [vmem:[#allocation2 + $0x18] sm:$0xff] %vm510_vm3, %v493_v45  ;;  %1056 = vmatmul.msk.f32.gmra.mxu2 %vm783_vm10, %v771_v48 }
 0x114   : > { %v748_v49 = vpop.permute.xlu0 %747 }
 0x115   : > { %v489_v50 = vpop.permute.xlu1 %488  ;;  %765 = vst.msk [vmem:[#allocation2 + $0x38] sm:$0xff] %vm757_vm9, %v748_v49 }
 0x116   : > { %512 = vst.msk [vmem:[#allocation2 + $0x8] sm:$0xff] %vm510_vm3, %v489_v50  ;;  %v736_v58 = vpop.permute.xlu2 %735 }
 0x11c   : > { %v538_v52 = vpop.permute.xlu0 %537  ;;  %v773_v53 = vld [vmem:[#allocation2 + $0x38] sm:$0xff] }
 0x11d   : > { %v542_v54 = vpop.permute.xlu1 %541  ;;  %561 = vst.msk [vmem:[#allocation2 + $0x8] sm:$0xff] %vm559_vm4, %v538_v52  ;;  %1058 = vmatmul.msk.f32.gmra.mxu3 %vm783_vm10, %v773_v53 }
 0x11e   : > { %563 = vst.msk [vmem:[#allocation2 + $0x18] sm:$0xff] %vm559_vm4, %v542_v54 }
 0x11f   : > { %610 = vst.msk [vmem:[#allocation2 + $0x8] sm:$0xff] %vm608_vm6, %v587_v51 }
 0x124   : > { %v591_v56 = vpop.permute.xlu0 %590 }
 0x125   : > { %v637_v57 = vpop.permute.xlu1 %636  ;;  %612 = vst.msk [vmem:[#allocation2 + $0x18] sm:$0xff] %vm608_vm6, %v591_v56 }
 0x126   : > { %660 = vst.msk [vmem:[#allocation2 + $0x8] sm:$0xff] %vm658_vm7, %v637_v57 }
 0x127   : > { %662 = vst.msk [vmem:[#allocation2 + $0x18] sm:$0xff] %vm658_vm7, %v641_v55 }
 0x12c   : > { %v687_v59 = vpop.permute.xlu0 %686 }
 0x12d   : > { %v691_v60 = vpop.permute.xlu1 %690  ;;  %710 = vst.msk [vmem:[#allocation2 + $0x8] sm:$0xff] %vm708_vm8, %v687_v59 }
 0x12e   : > { %712 = vst.msk [vmem:[#allocation2 + $0x18] sm:$0xff] %vm708_vm8, %v691_v60 }
 0x12f   : > { %759 = vst.msk [vmem:[#allocation2 + $0x8] sm:$0xff] %vm757_vm9, %v736_v58 }
 0x134   : > { %v740_v61 = vpop.permute.xlu0 %739 }
 0x135   : > { %761 = vst.msk [vmem:[#allocation2 + $0x18] sm:$0xff] %vm757_vm9, %v740_v61 }
 0x136   : > { %v767_v62 = vld [vmem:[#allocation2 + $0x8] sm:$0xff] }
 0x137   : > { %1052 = vmatmul.msk.f32.gmra.mxu0 %vm783_vm10, %v767_v62 }
 0x13c   : > { %v769_v63 = vld [vmem:[#allocation2 + $0x18] sm:$0xff] }
 0x13d   : > { %1054 = vmatmul.msk.f32.gmra.mxu1 %vm783_vm10, %v769_v63 }
 0x148   : > { %v841_v3 = vpop.f32.mrf.mxu2 }
 0x149   : > { %v842_v4 = vadd.f32 %v1145_v2, %v841_v3  ;;  %v847_v5 = vpop.f32.mrf.mxu3 }
 0x14a   : > { %v848_v6 = vadd.f32 %v1145_v2, %v847_v5 }
 0x14b   : > { %858 = vst.msk [vmem:[%s327_s16 + $0x20] sm:$0xff] %vm853_vm11, %v842_v4 }
 0x14c   : > { %860 = vst.msk [vmem:[%s327_s16 + $0x30] sm:$0xff] %vm853_vm11, %v848_v6 }
 0x182   : > { %v829_v7 = vpop.f32.mrf.mxu0 }
 0x183   : > { %v830_v8 = vadd.f32 %v1145_v2, %v829_v7  ;;  %v835_v9 = vpop.f32.mrf.mxu1 }
 0x184   : > { %v836_v10 = vadd.f32 %v1145_v2, %v835_v9 }
 0x185   : > { %854 = vst.msk [vmem:[%s327_s16] sm:$0xff] %vm853_vm11, %v830_v8 }
 0x186   : > { %856 = vst.msk [vmem:[%s327_s16 + $0x10] sm:$0xff] %vm853_vm11, %v836_v10 }
 0x192   : > { %v844_v11 = vpop.f32.mrf.mxu2 }
 0x193   : > { %v845_v12 = vadd.f32 %v1145_v2, %v844_v11 }
 0x195   : > { %859 = vst.msk [vmem:[%s327_s16 + $0x28] sm:$0xff] %vm853_vm11, %v845_v12 }
 0x1a0   : > { %v850_v14 = vpop.f32.mrf.mxu3 }
 0x1a1   : > { %v851_v15 = vadd.f32 %v1145_v2, %v850_v14 }
 0x1a3   : > { %861 = vst.msk [vmem:[%s327_s16 + $0x38] sm:$0xff] %vm853_vm11, %v851_v15 }
 0x1b4   : > { %v832_v16 = vpop.f32.mrf.mxu0 }
 0x1b5   : > { %v833_v18 = vadd.f32 %v1145_v2, %v832_v16 }
 0x1b7   : > { %855 = vst.msk [vmem:[%s327_s16 + $0x8] sm:$0xff] %vm853_vm11, %v833_v18 }
 0x1ba   : > { %v838_v19 = vpop.f32.mrf.mxu1 }
 0x1bb   : > { %v839_v20 = vadd.f32 %v1145_v2, %v838_v19 }
 0x1bd   : > { %857 = vst.msk [vmem:[%s327_s16 + $0x18] sm:$0xff] %vm853_vm11, %v839_v20 }
 0x1be   : > { %1173 = shalt.err (!%p1170_p5)
}
 0x1bf   : > { %s1234_s20 = smov 128   ;;  %s1652_s16 = smov 8  }
 0x1c0   : > { %1081 = dma.vmem_to_hbm [thread:$0]  (%p1310_p4), %s877_s15, 1024, %s879_s19, %s863_s11, %s1234_s20, %s1234_s20, %s1652_s16  }
 0x1c1 PF: > { %p1087_p6 = scmp.ge.s32.totalorder %s1224_s26, 2  ;;  %s893_s12 = sand.u32 1, %s1204_s21  }
 0x1c2   : > { %s894_s27 = scalar_lea.sflag [#allocation4], %s893_s12 }
 0x1c3   : > { %p1084_p7 = pnand %p1087_p6, %p1317_p8 }
 0x1c5   : > { %p1085_p9 = pneg %p1084_p7 }
 0x1c7   : > { %1199 = dma.done.wait (%p1085_p9), %s894_s27, 1024  }
 0x1c8   : > { %1201 = vsyncadd (%p1085_p9), %s894_s27, 4294966272  ;;  %s19_s26 = sadd.s32 1, %s1224_s26   ;;  %s1653_s21 = smov %s1208_s22 }
 0x1c9   : > { %p16_p10 = scmp.ge.s32.totalorder %s19_s26, 4   ;;  %s1654_s22 = smov %s1212_s23 }
 0x1ca   : > { %s1655_s23 = smov %s1323_s10  ;;  %s1656_s24 = smov %s1220_s25 }
 0x1cb   : > { %s1657_s25 = smov %s1659_s29  ;;  %18 = sbr.rel (!%p16_p10) target bundleno = 4 (0x4), region = 96 }
 0x1d0   :  { %900 = vsyncpa [#allocation4], 1 }
 0x1d1   :  { %902 = vsyncpa [#allocation4 + $0x1], 1 }

</bundles_post_ra>
